<compile_context>
chip_gen: v6e
topology: v6e:2x2x1
jax: 0.10.0
libtpu: 0.0.40
codegen_flags: <defaults>
</compile_context>

<pallas_src>
import functools

import jax
import jax.numpy as jnp
from jax.experimental import pallas as pl
from jax.experimental.pallas import tpu as pltpu


def _fused_proj_kernel(x_ref, w_ref, b_ref, o_ref):
    # One MXU matmul per (tm, tn) tile, f32 accumulation; epilogue is only the
    # bias add + downcast (minimal VPU / store pressure).
    acc = jnp.dot(x_ref[...], w_ref[...], preferred_element_type=jnp.float32)
    o_ref[...] = (acc + b_ref[...]).astype(o_ref.dtype)


def _choose_tiles(M, N):
    """Row tile: MXU-aligned (multiple of 256 fills the 2x256 v6e/v7x MXU and
    is also a multiple of 128 for v5e) and large enough to amortize the
    ~0.35us per-grid-step overhead.  For small M use one block.  Column tile:
    lane-dense (multiple of 128); full N when it fits so the fused weight
    block is grid-constant."""
    tm = M if M <= 512 else 512
    tn = N if N <= 1536 else 1536
    return tm, tn


@functools.partial(
    jax.jit,
    static_argnames=("tm", "tn", "single_buffer_weights", "out_dtype"))
def _fused_projection(x2, w_fused, b_fused, *, tm, tn, single_buffer_weights,
                      out_dtype):
    M, D = x2.shape
    N = w_fused.shape[1]

    grid = (pl.cdiv(M, tm), pl.cdiv(N, tn))

    # Weight / bias blocks are grid-constant whenever tn == N; a single VMEM
    # buffer then suffices (no double-buffering of the big weight on v7x).
    if single_buffer_weights and tn == N:
        w_spec = pl.BlockSpec((D, tn), lambda i, j: (0, j),
                              pipeline_mode=pl.Buffered(1))
        b_spec = pl.BlockSpec((1, tn), lambda i, j: (0, j),
                              pipeline_mode=pl.Buffered(1))
    else:
        w_spec = pl.BlockSpec((D, tn), lambda i, j: (0, j))
        b_spec = pl.BlockSpec((1, tn), lambda i, j: (0, j))

    x_spec = pl.BlockSpec((tm, D), lambda i, j: (i, 0))
    o_spec = pl.BlockSpec((tm, tn), lambda i, j: (i, j))

    out_bytes = jnp.dtype(out_dtype).itemsize
    cost = pl.CostEstimate(
        flops=2 * M * D * N,
        transcendentals=0,
        bytes_accessed=(M * D * x2.dtype.itemsize
                        + D * N * w_fused.dtype.itemsize
                        + N * b_fused.dtype.itemsize
                        + M * N * out_bytes),
    )

    return pl.pallas_call(
        _fused_proj_kernel,
        out_shape=jax.ShapeDtypeStruct((M, N), out_dtype),
        grid_spec=pltpu.PrefetchScalarGridSpec(
            num_scalar_prefetch=0,
            grid=grid,
            in_specs=[x_spec, w_spec, b_spec],
            out_specs=o_spec,
        ),
        compiler_params=pltpu.CompilerParams(
            dimension_semantics=("parallel", "parallel"),
            vmem_limit_bytes=32 * 1024 * 1024,
        ),
        cost_estimate=cost,
    )(x2, w_fused, b_fused)


def multi_projection(x, wq, bq, wk, bk, wv, bv, *, tm=None, tn=None,
                     out_dtype=jnp.bfloat16):
    """x: (B, S, D).  wq/wk/wv: (D, D) stored in x@W form (already transposed
    relative to torch nn.Linear's (out, in) weight).  bq/bk/bv: (D,).
    Returns (q, k, v), each (B, S, D) in out_dtype."""
    B, S, D = x.shape
    M = B * S

    # bf16 inputs/weights -> full-rate MXU + half the HBM traffic; f32 accum.
    x2 = x.reshape(M, D).astype(jnp.bfloat16)
    w_fused = jnp.concatenate([wq, wk, wv], axis=1).astype(jnp.bfloat16)
    b_fused = jnp.concatenate([bq, bk, bv]).astype(jnp.float32).reshape(1, 3 * D)

    auto_tm, auto_tn = _choose_tiles(M, 3 * D)
    tm = auto_tm if tm is None else tm
    tn = auto_tn if tn is None else tn

    try:
        out = _fused_projection(x2, w_fused, b_fused, tm=tm, tn=tn,
                                single_buffer_weights=True, out_dtype=out_dtype)
    except Exception:  # pl.Buffered(1) unsupported on this build -> fallback
        out = _fused_projection(x2, w_fused, b_fused, tm=tm, tn=tn,
                                single_buffer_weights=False, out_dtype=out_dtype)

    q = out[:, :D].reshape(B, S, D)
    k = out[:, D:2 * D].reshape(B, S, D)
    v = out[:, 2 * D:].reshape(B, S, D)
    return q, k, v


def _init_linear_params(key, d):
    """Deterministic nn.Linear-style init: U(-1/sqrt(d), 1/sqrt(d)); weight is
    stored pre-transposed as (in, out) so the kernel computes x @ W."""
    kw, kb = jax.random.split(key)
    bound = 1.0 / (d ** 0.5)
    w = jax.random.uniform(kw, (d, d), jnp.float32, -bound, bound)
    b = jax.random.uniform(kb, (d,), jnp.float32, -bound, bound)
    return w, b


def _reference(x, wq, bq, wk, bk, wv, bv):
    # Same bf16 rounding of inputs/weights as the kernel, f32 math.
    xb = x.astype(jnp.bfloat16).astype(jnp.float32)

    def proj(w, b):
        wb = w.astype(jnp.bfloat16).astype(jnp.float32)
        return xb @ wb + b

    return proj(wq, bq), proj(wk, bk), proj(wv, bv)


if __name__ == "__main__":
    D = 128
    key = jax.random.PRNGKey(0)
    kx, kq, kk, kv, kx2 = jax.random.split(key, 5)

    wq, bq = _init_linear_params(kq, D)
    wk, bk = _init_linear_params(kk, D)
    wv, bv = _init_linear_params(kv, D)

    # Small shape (B=2, S=8, D=128): M=16 -> one (M, D) block, grid (1, 1).
    x_small = jax.random.normal(kx, (2, 8, D), jnp.float32)
    q, k, v = multi_projection(x_small, wq, bq, wk, bk, wv, bv)
    jax.block_until_ready((q, k, v))

    q_r, k_r, v_r = _reference(x_small, wq, bq, wk, bk, wv, bv)
    for got, ref in ((q, q_r), (k, k_r), (v, v_r)):
        assert jnp.allclose(got.astype(jnp.float32), ref, atol=2e-2, rtol=2e-2)

    # Larger M with a ragged last row tile (M=1000, tm=512) to exercise the
    # padded/tiled path flagged in the review's correctness note.
    x_big = jax.random.normal(kx2, (4, 250, D), jnp.float32)
    q2, k2, v2 = multi_projection(x_big, wq, bq, wk, bk, wv, bv)
    jax.block_until_ready((q2, k2, v2))

    q2_r, k2_r, v2_r = _reference(x_big, wq, bq, wk, bk, wv, bv)
    for got, ref in ((q2, q2_r), (k2, k2_r), (v2, v2_r)):
        assert jnp.allclose(got.astype(jnp.float32), ref, atol=2e-2, rtol=2e-2)

    print("KERNEL_OK")
</pallas_src>

<mosaic_0001>
module attributes {stable_mosaic.version = 11 : i64} {
  func.func @_fused_proj_kernel(%arg0: i32, %arg1: i32, %arg2: memref<16x128xbf16, #tpu.memory_space<vmem>>, %arg3: memref<128x384xbf16, #tpu.memory_space<vmem>>, %arg4: memref<1x384xf32, #tpu.memory_space<vmem>>, %arg5: memref<16x384xbf16, #tpu.memory_space<vmem>>) attributes {dimension_semantics = [#tpu.dimension_semantics<parallel>, #tpu.dimension_semantics<parallel>], iteration_bounds = array<i64: 1, 1>, scalar_prefetch = 0 : i64, scratch_operands = 0 : i64, tpu.core_type = #tpu.core_type<tc>, window_params = [{transform_indices = @transform_0, window_bounds = array<i64: 16, 128>}, {pipeline_mode = #tpu.pipeline_mode<synchronous>, transform_indices = @transform_1, window_bounds = array<i64: 128, 384>}, {pipeline_mode = #tpu.pipeline_mode<synchronous>, transform_indices = @transform_2, window_bounds = array<i64: 1, 384>}, {transform_indices = @transform_3, window_bounds = array<i64: 16, 384>}]} {
    %c0 = arith.constant 0 : index
    %c0_0 = arith.constant 0 : index
    %0 = vector.load %arg2[%c0, %c0_0] : memref<16x128xbf16, #tpu.memory_space<vmem>>, vector<16x128xbf16>
    %c0_1 = arith.constant 0 : index
    %c0_2 = arith.constant 0 : index
    %1 = vector.load %arg3[%c0_1, %c0_2] : memref<128x384xbf16, #tpu.memory_space<vmem>>, vector<128x384xbf16>
    %cst = arith.constant dense<0.000000e+00> : vector<16x384xf32>
    %2 = tpu.matmul %0, %1, %cst {dimension_numbers = #tpu.dot_dimension_numbers<[1], [0], [0], [1], [0, 0, 1, 1], [], []>} : vector<16x128xbf16>, vector<128x384xbf16>, vector<16x384xf32> -> vector<16x384xf32>
    %c0_3 = arith.constant 0 : index
    %c0_4 = arith.constant 0 : index
    %3 = vector.load %arg4[%c0_3, %c0_4] : memref<1x384xf32, #tpu.memory_space<vmem>>, vector<1x384xf32>
    %4 = vector.broadcast %3 : vector<1x384xf32> to vector<16x384xf32>
    %5 = arith.addf %2, %4 : vector<16x384xf32>
    %6 = arith.truncf %5 : vector<16x384xf32> to vector<16x384xbf16>
    %c0_5 = arith.constant 0 : index
    %c0_6 = arith.constant 0 : index
    %7 = vector.load %arg5[%c0_5, %c0_6] : memref<16x384xbf16, #tpu.memory_space<vmem>>, vector<16x384xbf16>
    tpu.vector_store %arg5[%c0_5, %c0_6], %6 {strides = array<i32>} : memref<16x384xbf16, #tpu.memory_space<vmem>>, vector<16x384xbf16>,
    return
  }
  func.func @transform_0(%arg0: i32, %arg1: i32) -> (i32, i32) {
    %c0_i32 = arith.constant 0 : i32
    %c0_i32_0 = arith.constant 0 : i32
    return %arg0, %c0_i32 : i32, i32
  }
  func.func @transform_1(%arg0: i32, %arg1: i32) -> (i32, i32) {
    %c0_i32 = arith.constant 0 : i32
    %c0_i32_0 = arith.constant 0 : i32
    return %c0_i32, %arg1 : i32, i32
  }
  func.func @transform_2(%arg0: i32, %arg1: i32) -> (i32, i32) {
    %c0_i32 = arith.constant 0 : i32
    %c0_i32_0 = arith.constant 0 : i32
    return %c0_i32, %arg1 : i32, i32
  }
  func.func @transform_3(%arg0: i32, %arg1: i32) -> (i32, i32) {
    %c0_i32 = arith.constant 0 : i32
    return %arg0, %arg1 : i32, i32
  }
}

module attributes {stable_mosaic.version = 11 : i64} {
  func.func @_fused_proj_kernel(%arg0: i32, %arg1: i32, %arg2: memref<16x128xbf16, #tpu.memory_space<vmem>>, %arg3: memref<128x384xbf16, #tpu.memory_space<vmem>>, %arg4: memref<1x384xf32, #tpu.memory_space<vmem>>, %arg5: memref<16x384xbf16, #tpu.memory_space<vmem>>) attributes {dimension_semantics = [#tpu.dimension_semantics<parallel>, #tpu.dimension_semantics<parallel>], iteration_bounds = array<i64: 1, 1>, scalar_prefetch = 0 : i64, scratch_operands = 0 : i64, tpu.core_type = #tpu.core_type<tc>, window_params = [{transform_indices = @transform_0, window_bounds = array<i64: 16, 128>}, {transform_indices = @transform_1, window_bounds = array<i64: 128, 384>}, {transform_indices = @transform_2, window_bounds = array<i64: 1, 384>}, {transform_indices = @transform_3, window_bounds = array<i64: 16, 384>}]} {
    %c0 = arith.constant 0 : index
    %c0_0 = arith.constant 0 : index
    %0 = vector.load %arg2[%c0, %c0_0] : memref<16x128xbf16, #tpu.memory_space<vmem>>, vector<16x128xbf16>
    %c0_1 = arith.constant 0 : index
    %c0_2 = arith.constant 0 : index
    %1 = vector.load %arg3[%c0_1, %c0_2] : memref<128x384xbf16, #tpu.memory_space<vmem>>, vector<128x384xbf16>
    %cst = arith.constant dense<0.000000e+00> : vector<16x384xf32>
    %2 = tpu.matmul %0, %1, %cst {dimension_numbers = #tpu.dot_dimension_numbers<[1], [0], [0], [1], [0, 0, 1, 1], [], []>} : vector<16x128xbf16>, vector<128x384xbf16>, vector<16x384xf32> -> vector<16x384xf32>
    %c0_3 = arith.constant 0 : index
    %c0_4 = arith.constant 0 : index
    %3 = vector.load %arg4[%c0_3, %c0_4] : memref<1x384xf32, #tpu.memory_space<vmem>>, vector<1x384xf32>
    %4 = vector.broadcast %3 : vector<1x384xf32> to vector<16x384xf32>
    %5 = arith.addf %2, %4 : vector<16x384xf32>
    %6 = arith.truncf %5 : vector<16x384xf32> to vector<16x384xbf16>
    %c0_5 = arith.constant 0 : index
    %c0_6 = arith.constant 0 : index
    %7 = vector.load %arg5[%c0_5, %c0_6] : memref<16x384xbf16, #tpu.memory_space<vmem>>, vector<16x384xbf16>
    tpu.vector_store %arg5[%c0_5, %c0_6], %6 {strides = array<i32>} : memref<16x384xbf16, #tpu.memory_space<vmem>>, vector<16x384xbf16>,
    return
  }
  func.func @transform_0(%arg0: i32, %arg1: i32) -> (i32, i32) {
    %c0_i32 = arith.constant 0 : i32
    %c0_i32_0 = arith.constant 0 : i32
    return %arg0, %c0_i32 : i32, i32
  }
  func.func @transform_1(%arg0: i32, %arg1: i32) -> (i32, i32) {
    %c0_i32 = arith.constant 0 : i32
    %c0_i32_0 = arith.constant 0 : i32
    return %c0_i32, %arg1 : i32, i32
  }
  func.func @transform_2(%arg0: i32, %arg1: i32) -> (i32, i32) {
    %c0_i32 = arith.constant 0 : i32
    %c0_i32_0 = arith.constant 0 : i32
    return %c0_i32, %arg1 : i32, i32
  }
  func.func @transform_3(%arg0: i32, %arg1: i32) -> (i32, i32) {
    %c0_i32 = arith.constant 0 : i32
    return %arg0, %arg1 : i32, i32
  }
}

</mosaic_0001>

<bundles_post_ra>
// kernel: _fused_projection.1
= control target key start
LH: loop header
LB: loop body
LE: loop exit
PB: predicated region body
PF: predicated region fallthrough
CT: control target
= control target key end

     0   :  { %8 = vsyncpa [#allocation3], 0  ;;  %s574_s0 = inlined_call_operand.hbm [shape: bf16[16,128], index: 0, kind: input, shape index: {}]   ;;  %s575_s1 = inlined_call_operand.hbm [shape: bf16[128,384], index: 1, kind: input, shape index: {}]   ;;  %s576_s2 = inlined_call_operand.vmem [shape: f32[1,384], index: 2, kind: input, shape index: {}]   ;;  %s577_s3 = inlined_call_operand.hbm [shape: bf16[16,384], index: 3, kind: output, shape index: {}]  }
   0x1   :  { %9 = vsyncpa [#allocation6], 0 }
   0x2   :  { %10 = vsyncpa [#allocation4], 0  ;;  %s526_s12 = smov [#allocation2]  }
   0x3   :  { %s16_s13 = sshll.u32 %s526_s12, 4  ;;  %s17_s13 = int_to_ptr.vmem [resolvable:$true] %s16_s13 }
   0x4   :  { %s468_s14 = scalar_lea.vmem %s17_s13, 128  ;;  %p473_p1 = scmp.lt.s32.totalorder %s17_s13, %s17_s13 }
   0x5   :  { %p469_p0 = scmp.ne.s32.totalorder %s17_s13, %s468_s14  ;;  %p474_p2 = scmp.lt.s32.totalorder %s468_s14, %s468_s14 }
   0x7   :  { %p475_p3 = por %p474_p2, %p473_p1 }
   0x9   :  { %p476_p4 = pnand %p475_p3, %p469_p0 }
   0xb   :  { %479 = shalt.err (!%p476_p4)
}
   0xc   :  { %s527_s15 = smov 64   ;;  %s528_s16 = smov 4  }
   0xd   :  { %22 = dma.hbm_to_vmem [thread:$0]  %s574_s0, 128, %s17_s13, [#allocation3], %s527_s15, %s527_s15, %s528_s16  }
   0xe   :  { %s529_s19 = smov [#allocation5]  }
   0xf   :  { %s28_s20 = sshll.u32 %s529_s19, 4  ;;  %s29_s20 = int_to_ptr.vmem [resolvable:$true] %s28_s20 }
  0x10   :  { %s488_s21 = scalar_lea.vmem %s29_s20, 3072  ;;  %p493_p6 = scmp.lt.s32.totalorder %s29_s20, %s29_s20 }
  0x11   :  { %p489_p5 = scmp.ne.s32.totalorder %s29_s20, %s488_s21  ;;  %p494_p7 = scmp.lt.s32.totalorder %s488_s21, %s488_s21 }
  0x13   :  { %p495_p8 = por %p494_p7, %p493_p6 }
  0x15   :  { %p496_p9 = pnand %p495_p8, %p489_p5 }
  0x17   :  { %499 = shalt.err (!%p496_p9)
}
  0x18   :  { %s530_s22 = smov 192   ;;  %s531_s23 = smov 12  }
  0x19   :  { %34 = dma.hbm_to_vmem [thread:$0]  %s575_s1, 3072, %s29_s20, [#allocation6], %s530_s22, %s530_s22, %s531_s23  }
  0x1a   :  { %520 = dma.done.wait [#allocation3], 128  }
  0x1b   :  { %521 = vsyncadd [#allocation3], 4294967168 }
  0x1c   :  { %522 = dma.done.wait [#allocation6], 3072  }
  0x1d   :  { %523 = vsyncadd [#allocation6], 4294964224  ;;  %v532_v0 = vmov 0.0   ;;  %vm533_vm0 = vmmov 0   ;;  %v534_v1 = vmov 0   ;;  %v459_v26 = vld [vmem:[#allocation2] sm:$0xff]   ;;  %v80_v27 = vlaneseq }
  0x1e   :  { %397 = vmatprep.subr.bf16.mxu1 %v532_v0  ;;  %413 = vmatprep.mubr.msk.bf16.mxu1 %vm533_vm0, %v532_v0  ;;  %v427_v2 = vld [vmem:[#allocation5 + $0xac] ss:$12 sps:$4 sm:$0xff]   ;;  %v429_v3 = vld [vmem:[#allocation5 + $0xb0] ss:$12 sps:$4 sm:$0xff]   ;;  %v430_v4 = vld [vmem:[#allocation5 + $0xa8] ss:$12 sps:$4 sm:$0xff]  }
  0x1f   :  { %261 = vmatprep.mubr.bf16.mxu0 %v534_v1  ;;  %229 = vmatprep.subr.bf16.mxu0 %v427_v2  ;;  %v431_v5 = vld [vmem:[#allocation5 + $0x94] ss:$12 sps:$4 sm:$0xff]   ;;  %v433_v6 = vld [vmem:[#allocation5 + $0x98] ss:$12 sps:$4 sm:$0xff]   ;;  %v434_v7 = vld [vmem:[#allocation5 + $0x90] ss:$12 sps:$4 sm:$0xff]  }
  0x20   :  { %398 = vmatpush3.bf16.msra.mxu1 %v429_v3  ;;  %230 = vmatpush1.bf16.msra.mxu0 %v430_v4  ;;  %v435_v8 = vld [vmem:[#allocation5 + $0x7c] ss:$12 sps:$4 sm:$0xff]   ;;  %v437_v9 = vld [vmem:[#allocation5 + $0x80] ss:$12 sps:$4 sm:$0xff]   ;;  %v438_v10 = vld [vmem:[#allocation5 + $0x78] ss:$12 sps:$4 sm:$0xff]  }
  0x21   :  { %399 = vmatprep.subr.bf16.mxu1 %v532_v0  ;;  %231 = vmatprep.subr.bf16.mxu0 %v431_v5  ;;  %v439_v11 = vld [vmem:[#allocation5 + $0x64] ss:$12 sps:$4 sm:$0xff]   ;;  %v441_v12 = vld [vmem:[#allocation5 + $0x68] ss:$12 sps:$4 sm:$0xff]   ;;  %v442_v13 = vld [vmem:[#allocation5 + $0x60] ss:$12 sps:$4 sm:$0xff]  }
  0x22   :  { %v443_v14 = vld [vmem:[#allocation5 + $0x4c] ss:$12 sps:$4 sm:$0xff]   ;;  %v445_v15 = vld [vmem:[#allocation5 + $0x50] ss:$12 sps:$4 sm:$0xff]   ;;  %v446_v16 = vld [vmem:[#allocation5 + $0x48] ss:$12 sps:$4 sm:$0xff]  }
  0x23   :  { %v447_v17 = vld [vmem:[#allocation5 + $0x34] ss:$12 sps:$4 sm:$0xff]   ;;  %v449_v18 = vld [vmem:[#allocation5 + $0x38] ss:$12 sps:$4 sm:$0xff]   ;;  %v450_v19 = vld [vmem:[#allocation5 + $0x30] ss:$12 sps:$4 sm:$0xff]  }
  0x24   :  { %400 = vmatpush3.bf16.msra.mxu1 %v433_v6  ;;  %232 = vmatpush1.bf16.msra.mxu0 %v434_v7  ;;  %v451_v20 = vld [vmem:[#allocation5 + $0x1c] ss:$12 sps:$4 sm:$0xff]   ;;  %v453_v21 = vld [vmem:[#allocation5 + $0x20] ss:$12 sps:$4 sm:$0xff]   ;;  %v454_v22 = vld [vmem:[#allocation5 + $0x18] ss:$12 sps:$4 sm:$0xff]  }
  0x25   :  { %401 = vmatprep.subr.bf16.mxu1 %v532_v0  ;;  %233 = vmatprep.subr.bf16.mxu0 %v435_v8  ;;  %v455_v23 = vld [vmem:[#allocation5 + $0x4] ss:$12 sps:$4 sm:$0xff]   ;;  %v457_v24 = vld [vmem:[#allocation5 + $0x8] ss:$12 sps:$4 sm:$0xff]   ;;  %v458_v25 = vld [vmem:[#allocation5] ss:$12 sps:$4 sm:$0xff]  }
  0x26   :  { %v81_v28 = vshrl.u32 %v80_v27, 7  ;;  %v78_v30 = vld [vmem:[%s576_s2] sm:$0x7]  ;;  %s535_s2 = smov [#allocation7]  }
  0x27   :  { %s342_s26 = sshll.u32 %s535_s2, 4  ;;  %s343_s26 = int_to_ptr.vmem [resolvable:$true] %s342_s26 }
  0x28   :  { %402 = vmatpush3.bf16.msra.mxu1 %v437_v9  ;;  %234 = vmatpush1.bf16.msra.mxu0 %v438_v10  ;;  %v90_v29 = vsub.s32 2, %v81_v28  ;;  %v82_v31 = vsub.s32 0, %v81_v28  ;;  %v86_v32 = vsub.s32 1, %v81_v28  ;;  %s500_s27 = scalar_lea.vmem %s343_s26, 384  ;;  %p505_p11 = scmp.lt.s32.totalorder %s343_s26, %s343_s26 }
  0x29   :  { %403 = vmatprep.subr.bf16.mxu1 %v532_v0  ;;  %235 = vmatprep.subr.bf16.mxu0 %v439_v11  ;;  %p501_p10 = scmp.ne.s32.totalorder %s343_s26, %s500_s27  ;;  %p506_p12 = scmp.lt.s32.totalorder %s500_s27, %s500_s27 }
  0x2a   :  { %v91_v33 = vrot.slane %v78_v30, %v90_v29  ;;  %v83_v35 = vrot.slane %v78_v30, %v82_v31  ;;  %v87_v36 = vrot.slane %v78_v30, %v86_v32 }
  0x2b   :  { %p507_p13 = por %p506_p12, %p505_p11 }
  0x2c   :  { %404 = vmatpush3.bf16.msra.mxu1 %v441_v12  ;;  %236 = vmatpush1.bf16.msra.mxu0 %v442_v13 }
  0x2d   :  { %405 = vmatprep.subr.bf16.mxu1 %v532_v0  ;;  %237 = vmatprep.subr.bf16.mxu0 %v443_v14  ;;  %p508_p0 = pnand %p507_p13, %p501_p10 }
  0x30   :  { %406 = vmatpush3.bf16.msra.mxu1 %v445_v15  ;;  %238 = vmatpush1.bf16.msra.mxu0 %v446_v16 }
  0x31   :  { %407 = vmatprep.subr.bf16.mxu1 %v532_v0  ;;  %239 = vmatprep.subr.bf16.mxu0 %v447_v17 }
  0x34   :  { %408 = vmatpush3.bf16.msra.mxu1 %v449_v18  ;;  %240 = vmatpush1.bf16.msra.mxu0 %v450_v19 }
  0x35   :  { %409 = vmatprep.subr.bf16.mxu1 %v532_v0  ;;  %241 = vmatprep.subr.bf16.mxu0 %v451_v20 }
  0x38   :  { %410 = vmatpush3.bf16.msra.mxu1 %v453_v21  ;;  %242 = vmatpush1.bf16.msra.mxu0 %v454_v22 }
  0x39   :  { %411 = vmatprep.subr.bf16.mxu1 %v532_v0  ;;  %243 = vmatprep.subr.bf16.mxu0 %v455_v23 }
  0x3c   :  { %412 = vmatpush3.bf16.msra.mxu1 %v457_v24  ;;  %244 = vmatpush1.bf16.msra.mxu0 %v458_v25 }
  0x3f   :  { %414 = vmatmul.mubr.bf16.vlgmr.msra.gmra.mxu1 %v459_v26  ;;  %262 = vmatmul.mubr.bf16.vlgmr.msra.gmra.mxu0 %v459_v26 }
  0xff   :  { %v306_v34 = vpop.f32.mrf.mxu1  ;;  %v263_v38 = vpop.f32.mrf.mxu0 }
 0x100   :  { %v307_v37 = vadd.f32 %v306_v34, %v91_v33  ;;  %v264_v42 = vadd.f32 %v263_v38, %v83_v35 }
 0x101   :  { %v415_v39 = vpop.f32.mrf.mxu1  ;;  %v265_v41 = vpop.f32.mrf.mxu0 }
 0x102   :  { %v385_v40 = vpack.c.bf16 %v307_v37, %v307_v37  ;;  %v266_v43 = vadd.f32 %v265_v41, %v87_v36 }
 0x103   :  { %v309_v44 = vpop.f32.mrf.mxu1  ;;  %v267_v46 = vpop.f32.mrf.mxu0 }
 0x104   :  { %334 = vst [vmem:[#allocation7 + $0x8] sm:$0xf] %v385_v40  ;;  %v310_v45 = vadd.f32 %v309_v44, %v91_v33  ;;  %v384_v47 = vpack.c.bf16 %v266_v43, %v264_v42  ;;  %v268_v51 = vadd.f32 %v267_v46, %v83_v35 }
 0x105   :  { %v416_v48 = vpop.f32.mrf.mxu1  ;;  %v269_v50 = vpop.f32.mrf.mxu0 }
 0x106   :  { %v387_v49 = vpack.c.bf16 %v310_v45, %v310_v45  ;;  %333 = vst [vmem:[#allocation7] sm:$0xff] %v384_v47  ;;  %v270_v52 = vadd.f32 %v269_v50, %v87_v36 }
 0x108   :  { %336 = vst [vmem:[#allocation7 + $0x14] sm:$0xf] %v387_v49  ;;  %v386_v53 = vpack.c.bf16 %v270_v52, %v268_v51 }
 0x10a   :  { %335 = vst [vmem:[#allocation7 + $0xc] sm:$0xff] %v386_v53 }
 0x10b   :  { %511 = shalt.err (!%p508_p0)
}
 0x10c   :  { %348 = dma.vmem_to_hbm [thread:$0]  %s343_s26, 384, %s577_s3, [#allocation4], %s530_s22, %s530_s22, %s531_s23  }
 0x10d   :  { %524 = dma.done.wait [#allocation4], 384  }
 0x10e   :  { %525 = vsyncadd [#allocation4], 4294966912 }
 0x10f   :  { %352 = vsyncpa [#allocation3], 1 }
 0x110   :  { %353 = vsyncpa [#allocation6], 1 }
 0x111   :  { %354 = vsyncpa [#allocation4], 1 }

// kernel: _fused_projection.1
= control target key start
LH: loop header
LB: loop body
LE: loop exit
PB: predicated region body
PF: predicated region fallthrough
CT: control target
= control target key end

     0   :  { %8 = vsyncpa [#allocation3], 0  ;;  %s574_s0 = inlined_call_operand.hbm [shape: bf16[16,128], index: 0, kind: input, shape index: {}]   ;;  %s575_s1 = inlined_call_operand.hbm [shape: bf16[128,384], index: 1, kind: input, shape index: {}]   ;;  %s576_s2 = inlined_call_operand.vmem [shape: f32[1,384], index: 2, kind: input, shape index: {}]   ;;  %s577_s3 = inlined_call_operand.hbm [shape: bf16[16,384], index: 3, kind: output, shape index: {}]  }
   0x1   :  { %9 = vsyncpa [#allocation6], 0 }
   0x2   :  { %10 = vsyncpa [#allocation4], 0  ;;  %s526_s12 = smov [#allocation2]  }
   0x3   :  { %s16_s13 = sshll.u32 %s526_s12, 4  ;;  %s17_s13 = int_to_ptr.vmem [resolvable:$true] %s16_s13 }
   0x4   :  { %s468_s14 = scalar_lea.vmem %s17_s13, 128  ;;  %p473_p1 = scmp.lt.s32.totalorder %s17_s13, %s17_s13 }
   0x5   :  { %p469_p0 = scmp.ne.s32.totalorder %s17_s13, %s468_s14  ;;  %p474_p2 = scmp.lt.s32.totalorder %s468_s14, %s468_s14 }
   0x7   :  { %p475_p3 = por %p474_p2, %p473_p1 }
   0x9   :  { %p476_p4 = pnand %p475_p3, %p469_p0 }
   0xb   :  { %479 = shalt.err (!%p476_p4)
}
   0xc   :  { %s527_s15 = smov 64   ;;  %s528_s16 = smov 4  }
   0xd   :  { %22 = dma.hbm_to_vmem [thread:$0]  %s574_s0, 128, %s17_s13, [#allocation3], %s527_s15, %s527_s15, %s528_s16  }
   0xe   :  { %s529_s19 = smov [#allocation5]  }
   0xf   :  { %s28_s20 = sshll.u32 %s529_s19, 4  ;;  %s29_s20 = int_to_ptr.vmem [resolvable:$true] %s28_s20 }
  0x10   :  { %s488_s21 = scalar_lea.vmem %s29_s20, 3072  ;;  %p493_p6 = scmp.lt.s32.totalorder %s29_s20, %s29_s20 }
  0x11   :  { %p489_p5 = scmp.ne.s32.totalorder %s29_s20, %s488_s21  ;;  %p494_p7 = scmp.lt.s32.totalorder %s488_s21, %s488_s21 }
  0x13   :  { %p495_p8 = por %p494_p7, %p493_p6 }
  0x15   :  { %p496_p9 = pnand %p495_p8, %p489_p5 }
  0x17   :  { %499 = shalt.err (!%p496_p9)
}
  0x18   :  { %s530_s22 = smov 192   ;;  %s531_s23 = smov 12  }
  0x19   :  { %34 = dma.hbm_to_vmem [thread:$0]  %s575_s1, 3072, %s29_s20, [#allocation6], %s530_s22, %s530_s22, %s531_s23  }
  0x1a   :  { %520 = dma.done.wait [#allocation3], 128  }
  0x1b   :  { %521 = vsyncadd [#allocation3], 4294967168 }
  0x1c   :  { %522 = dma.done.wait [#allocation6], 3072  }
  0x1d   :  { %523 = vsyncadd [#allocation6], 4294964224  ;;  %v532_v0 = vmov 0.0   ;;  %vm533_vm0 = vmmov 0   ;;  %v534_v1 = vmov 0   ;;  %v459_v26 = vld [vmem:[#allocation2] sm:$0xff]   ;;  %v80_v27 = vlaneseq }
  0x1e   :  { %397 = vmatprep.subr.bf16.mxu1 %v532_v0  ;;  %413 = vmatprep.mubr.msk.bf16.mxu1 %vm533_vm0, %v532_v0  ;;  %v427_v2 = vld [vmem:[#allocation5 + $0xac] ss:$12 sps:$4 sm:$0xff]   ;;  %v429_v3 = vld [vmem:[#allocation5 + $0xb0] ss:$12 sps:$4 sm:$0xff]   ;;  %v430_v4 = vld [vmem:[#allocation5 + $0xa8] ss:$12 sps:$4 sm:$0xff]  }
  0x1f   :  { %261 = vmatprep.mubr.bf16.mxu0 %v534_v1  ;;  %229 = vmatprep.subr.bf16.mxu0 %v427_v2  ;;  %v431_v5 = vld [vmem:[#allocation5 + $0x94] ss:$12 sps:$4 sm:$0xff]   ;;  %v433_v6 = vld [vmem:[#allocation5 + $0x98] ss:$12 sps:$4 sm:$0xff]   ;;  %v434_v7 = vld [vmem:[#allocation5 + $0x90] ss:$12 sps:$4 sm:$0xff]  }
  0x20   :  { %398 = vmatpush3.bf16.msra.mxu1 %v429_v3  ;;  %230 = vmatpush1.bf16.msra.mxu0 %v430_v4  ;;  %v435_v8 = vld [vmem:[#allocation5 + $0x7c] ss:$12 sps:$4 sm:$0xff]   ;;  %v437_v9 = vld [vmem:[#allocation5 + $0x80] ss:$12 sps:$4 sm:$0xff]   ;;  %v438_v10 = vld [vmem:[#allocation5 + $0x78] ss:$12 sps:$4 sm:$0xff]  }
  0x21   :  { %399 = vmatprep.subr.bf16.mxu1 %v532_v0  ;;  %231 = vmatprep.subr.bf16.mxu0 %v431_v5  ;;  %v439_v11 = vld [vmem:[#allocation5 + $0x64] ss:$12 sps:$4 sm:$0xff]   ;;  %v441_v12 = vld [vmem:[#allocation5 + $0x68] ss:$12 sps:$4 sm:$0xff]   ;;  %v442_v13 = vld [vmem:[#allocation5 + $0x60] ss:$12 sps:$4 sm:$0xff]  }
  0x22   :  { %v443_v14 = vld [vmem:[#allocation5 + $0x4c] ss:$12 sps:$4 sm:$0xff]   ;;  %v445_v15 = vld [vmem:[#allocation5 + $0x50] ss:$12 sps:$4 sm:$0xff]   ;;  %v446_v16 = vld [vmem:[#allocation5 + $0x48] ss:$12 sps:$4 sm:$0xff]  }
  0x23   :  { %v447_v17 = vld [vmem:[#allocation5 + $0x34] ss:$12 sps:$4 sm:$0xff]   ;;  %v449_v18 = vld [vmem:[#allocation5 + $0x38] ss:$12 sps:$4 sm:$0xff]   ;;  %v450_v19 = vld [vmem:[#allocation5 + $0x30] ss:$12 sps:$4 sm:$0xff]  }
  0x24   :  { %400 = vmatpush3.bf16.msra.mxu1 %v433_v6  ;;  %232 = vmatpush1.bf16.msra.mxu0 %v434_v7  ;;  %v451_v20 = vld [vmem:[#allocation5 + $0x1c] ss:$12 sps:$4 sm:$0xff]   ;;  %v453_v21 = vld [vmem:[#allocation5 + $0x20] ss:$12 sps:$4 sm:$0xff]   ;;  %v454_v22 = vld [vmem:[#allocation5 + $0x18] ss:$12 sps:$4 sm:$0xff]  }
  0x25   :  { %401 = vmatprep.subr.bf16.mxu1 %v532_v0  ;;  %233 = vmatprep.subr.bf16.mxu0 %v435_v8  ;;  %v455_v23 = vld [vmem:[#allocation5 + $0x4] ss:$12 sps:$4 sm:$0xff]   ;;  %v457_v24 = vld [vmem:[#allocation5 + $0x8] ss:$12 sps:$4 sm:$0xff]   ;;  %v458_v25 = vld [vmem:[#allocation5] ss:$12 sps:$4 sm:$0xff]  }
  0x26   :  { %v81_v28 = vshrl.u32 %v80_v27, 7  ;;  %v78_v30 = vld [vmem:[%s576_s2] sm:$0x7]  ;;  %s535_s2 = smov [#allocation7]  }
  0x27   :  { %s342_s26 = sshll.u32 %s535_s2, 4  ;;  %s343_s26 = int_to_ptr.vmem [resolvable:$true] %s342_s26 }
  0x28   :  { %402 = vmatpush3.bf16.msra.mxu1 %v437_v9  ;;  %234 = vmatpush1.bf16.msra.mxu0 %v438_v10  ;;  %v90_v29 = vsub.s32 2, %v81_v28  ;;  %v82_v31 = vsub.s32 0, %v81_v28  ;;  %v86_v32 = vsub.s32 1, %v81_v28  ;;  %s500_s27 = scalar_lea.vmem %s343_s26, 384  ;;  %p505_p11 = scmp.lt.s32.totalorder %s343_s26, %s343_s26 }
  0x29   :  { %403 = vmatprep.subr.bf16.mxu1 %v532_v0  ;;  %235 = vmatprep.subr.bf16.mxu0 %v439_v11  ;;  %p501_p10 = scmp.ne.s32.totalorder %s343_s26, %s500_s27  ;;  %p506_p12 = scmp.lt.s32.totalorder %s500_s27, %s500_s27 }
  0x2a   :  { %v91_v33 = vrot.slane %v78_v30, %v90_v29  ;;  %v83_v35 = vrot.slane %v78_v30, %v82_v31  ;;  %v87_v36 = vrot.slane %v78_v30, %v86_v32 }
  0x2b   :  { %p507_p13 = por %p506_p12, %p505_p11 }
  0x2c   :  { %404 = vmatpush3.bf16.msra.mxu1 %v441_v12  ;;  %236 = vmatpush1.bf16.msra.mxu0 %v442_v13 }
  0x2d   :  { %405 = vmatprep.subr.bf16.mxu1 %v532_v0  ;;  %237 = vmatprep.subr.bf16.mxu0 %v443_v14  ;;  %p508_p0 = pnand %p507_p13, %p501_p10 }
  0x30   :  { %406 = vmatpush3.bf16.msra.mxu1 %v445_v15  ;;  %238 = vmatpush1.bf16.msra.mxu0 %v446_v16 }
  0x31   :  { %407 = vmatprep.subr.bf16.mxu1 %v532_v0  ;;  %239 = vmatprep.subr.bf16.mxu0 %v447_v17 }
  0x34   :  { %408 = vmatpush3.bf16.msra.mxu1 %v449_v18  ;;  %240 = vmatpush1.bf16.msra.mxu0 %v450_v19 }
  0x35   :  { %409 = vmatprep.subr.bf16.mxu1 %v532_v0  ;;  %241 = vmatprep.subr.bf16.mxu0 %v451_v20 }
  0x38   :  { %410 = vmatpush3.bf16.msra.mxu1 %v453_v21  ;;  %242 = vmatpush1.bf16.msra.mxu0 %v454_v22 }
  0x39   :  { %411 = vmatprep.subr.bf16.mxu1 %v532_v0  ;;  %243 = vmatprep.subr.bf16.mxu0 %v455_v23 }
  0x3c   :  { %412 = vmatpush3.bf16.msra.mxu1 %v457_v24  ;;  %244 = vmatpush1.bf16.msra.mxu0 %v458_v25 }
  0x3f   :  { %414 = vmatmul.mubr.bf16.vlgmr.msra.gmra.mxu1 %v459_v26  ;;  %262 = vmatmul.mubr.bf16.vlgmr.msra.gmra.mxu0 %v459_v26 }
  0xff   :  { %v306_v34 = vpop.f32.mrf.mxu1  ;;  %v263_v38 = vpop.f32.mrf.mxu0 }
 0x100   :  { %v307_v37 = vadd.f32 %v306_v34, %v91_v33  ;;  %v264_v42 = vadd.f32 %v263_v38, %v83_v35 }
 0x101   :  { %v415_v39 = vpop.f32.mrf.mxu1  ;;  %v265_v41 = vpop.f32.mrf.mxu0 }
 0x102   :  { %v385_v40 = vpack.c.bf16 %v307_v37, %v307_v37  ;;  %v266_v43 = vadd.f32 %v265_v41, %v87_v36 }
 0x103   :  { %v309_v44 = vpop.f32.mrf.mxu1  ;;  %v267_v46 = vpop.f32.mrf.mxu0 }
 0x104   :  { %334 = vst [vmem:[#allocation7 + $0x8] sm:$0xf] %v385_v40  ;;  %v310_v45 = vadd.f32 %v309_v44, %v91_v33  ;;  %v384_v47 = vpack.c.bf16 %v266_v43, %v264_v42  ;;  %v268_v51 = vadd.f32 %v267_v46, %v83_v35 }
 0x105   :  { %v416_v48 = vpop.f32.mrf.mxu1  ;;  %v269_v50 = vpop.f32.mrf.mxu0 }
 0x106   :  { %v387_v49 = vpack.c.bf16 %v310_v45, %v310_v45  ;;  %333 = vst [vmem:[#allocation7] sm:$0xff] %v384_v47  ;;  %v270_v52 = vadd.f32 %v269_v50, %v87_v36 }
 0x108   :  { %336 = vst [vmem:[#allocation7 + $0x14] sm:$0xf] %v387_v49  ;;  %v386_v53 = vpack.c.bf16 %v270_v52, %v268_v51 }
 0x10a   :  { %335 = vst [vmem:[#allocation7 + $0xc] sm:$0xff] %v386_v53 }
 0x10b   :  { %511 = shalt.err (!%p508_p0)
}
 0x10c   :  { %348 = dma.vmem_to_hbm [thread:$0]  %s343_s26, 384, %s577_s3, [#allocation4], %s530_s22, %s530_s22, %s531_s23  }
 0x10d   :  { %524 = dma.done.wait [#allocation4], 384  }
 0x10e   :  { %525 = vsyncadd [#allocation4], 4294966912 }
 0x10f   :  { %352 = vsyncpa [#allocation3], 1 }
 0x110   :  { %353 = vsyncpa [#allocation6], 1 }
 0x111   :  { %354 = vsyncpa [#allocation4], 1 }

</bundles_post_ra>
